<compile_context>
chip_gen: v7x
topology: tpu7x:2x2x1
jax: 0.10.0
libtpu: 0.0.40
codegen_flags: <defaults>
</compile_context>

<pallas_src>
import math
import jax
import jax.numpy as jnp
from jax.experimental import pallas as pl
from jax.experimental.pallas import tpu as pltpu

NUM_VARS = 64          # numVars (data-derived in the original script; fixed here)
NUM_HIDDEN = 32
NUM_LATENT = 16
HEADS_W = 2 * NUM_LATENT          # fused mu|logvar width
OUT_W = 128                       # packed output: dec(64) | mu(16) | logvar(16) | pad(32)

FLOPS_PER_ROW = 2 * 9728          # 2 * sum(in*out) over the 8 effective matmuls
TRANS_PER_ROW = 6 * NUM_HIDDEN + NUM_LATENT   # 6 tanh layers + 1 exp


def _round_up(x, m):
    return (x + m - 1) // m * m


def _choose_tile(bp, tile_b):
    """Largest multiple of 8 that divides bp and is <= tile_b (bp is a multiple of 8)."""
    tb = min(max(tile_b - tile_b % 8, 8), bp)
    while bp % tb:
        tb -= 8
    return tb


def vae_kernel(x_ref, eps_ref,
               w1, b1, w2, b2, w3, b3,                 # encoder trunk (w4 folded away)
               wh, bh,                                  # fused mu|logvar head (w4/b4 folded in)
               d1, db1, d2, db2, d3, db3, d4, db4,      # decoder
               out_ref):
    f32 = jnp.float32
    bf16 = jnp.bfloat16

    def lin(w, h, b):
        # Batch-in-lanes matmul: W[out,in] @ h[in,tb] on the MXU, bf16 operands,
        # f32 accumulation; bias [out,1] broadcast along lanes in f32.
        return jnp.dot(w[...], h.astype(bf16), preferred_element_type=f32) + b[...]

    # One entry transpose puts the batch on the 128-lane axis for the whole kernel.
    xT = x_ref[...].T                                    # (64, tb) f32
    h = jnp.tanh(lin(w1, xT, b1))                        # (32, tb)
    h = jnp.tanh(lin(w2, h, b2))
    h = jnp.tanh(lin(w3, h, b3))

    heads = lin(wh, h, bh)                               # (32, tb) = mu | logvar (sublane split)
    mu = heads[:NUM_LATENT, :]
    lv = heads[NUM_LATENT:, :]

    # Reparameterize: z = mu + eps * exp(0.5 * logvar)
    epsT = eps_ref[...].T                                # (16, tb) f32
    z = mu + epsT * jnp.exp(0.5 * lv)

    h = jnp.tanh(lin(d1, z, db1))
    h = jnp.tanh(lin(d2, h, db2))
    h = jnp.tanh(lin(d3, h, db3))
    dec = lin(d4, h, db4)                                # (64, tb)

    tb = dec.shape[1]
    pad = jnp.zeros((OUT_W - NUM_VARS - HEADS_W, tb), f32)
    slab = jnp.concatenate([dec, heads, pad], axis=0)    # (128, tb) f32
    # Exit transpose back to row-major, single unmasked 128-lane bf16 store.
    out_ref[...] = slab.T.astype(bf16)                   # (tb, 128)


def init_linear(key, in_f, out_f):
    """PyTorch nn.Linear default init: U(-1/sqrt(in_f), 1/sqrt(in_f)); W is [out,in]."""
    kw, kb = jax.random.split(key)
    bound = 1.0 / math.sqrt(in_f)
    w = jax.random.uniform(kw, (out_f, in_f), jnp.float32, -bound, bound)
    b = jax.random.uniform(kb, (out_f,), jnp.float32, -bound, bound)
    return w, b


def build_params(key):
    dims = [
        (NUM_VARS, NUM_HIDDEN), (NUM_HIDDEN, NUM_HIDDEN),     # encoder trunk
        (NUM_HIDDEN, NUM_HIDDEN), (NUM_HIDDEN, NUM_LATENT),
        (NUM_LATENT, NUM_LATENT), (NUM_LATENT, NUM_LATENT),   # mu / logvar heads
        (NUM_LATENT, NUM_HIDDEN), (NUM_HIDDEN, NUM_HIDDEN),   # decoder
        (NUM_HIDDEN, NUM_HIDDEN), (NUM_HIDDEN, NUM_VARS),
    ]
    keys = jax.random.split(key, len(dims))
    return [init_linear(k, i, o) for k, (i, o) in zip(keys, dims)]


def prepare_kernel_params(pairs):
    """Fuse mu|logvar heads, fold the purely-linear w4 layer into them (in f32),
    then cast weights to bf16 and reshape biases to [out, 1] f32."""
    (w1, b1), (w2, b2), (w3, b3), (w4, b4), (wm, bm), (wl, bl), \
        (d1, db1), (d2, db2), (d3, db3), (d4, db4) = pairs
    w_heads = jnp.concatenate([wm, wl], axis=0)          # (32, 16)
    b_heads = jnp.concatenate([bm, bl], axis=0)          # (32,)
    wh = w_heads @ w4                                    # (32, 32): enc->mu|lv in one matmul
    bh = w_heads @ b4 + b_heads                          # (32,)
    flat = []
    for w, b in [(w1, b1), (w2, b2), (w3, b3), (wh, bh),
                 (d1, db1), (d2, db2), (d3, db3), (d4, db4)]:
        flat.append(w.astype(jnp.bfloat16))
        flat.append(b.reshape(-1, 1).astype(jnp.float32))
    return flat


def autoencoder_forward(x, eps, kernel_params, *, tile_b=2048):
    B = x.shape[0]
    Bp = _round_up(B, 8)                      # pad at most 7 rows — never a full tile
    if Bp != B:
        x = jnp.pad(x, ((0, Bp - B), (0, 0)))
        eps = jnp.pad(eps, ((0, Bp - B), (0, 0)))
    tb = _choose_tile(Bp, tile_b)
    grid = (Bp // tb,)

    x_spec = pl.BlockSpec((tb, NUM_VARS), lambda i: (i, 0))
    eps_spec = pl.BlockSpec((tb, NUM_LATENT), lambda i: (i, 0))
    # Weights/biases: same block index every step -> resident in VMEM, no re-DMA.
    param_specs = [pl.BlockSpec(p.shape, lambda i: (0, 0)) for p in kernel_params]
    out_spec = pl.BlockSpec((tb, OUT_W), lambda i: (i, 0))

    param_bytes = sum(int(p.size) * p.dtype.itemsize for p in kernel_params)
    cost = pl.CostEstimate(
        flops=FLOPS_PER_ROW * Bp,
        transcendentals=TRANS_PER_ROW * Bp,
        bytes_accessed=Bp * (NUM_VARS * 4 + NUM_LATENT * 4 + OUT_W * 2) + param_bytes,
    )

    packed = pl.pallas_call(
        vae_kernel,
        out_shape=jax.ShapeDtypeStruct((Bp, OUT_W), jnp.bfloat16),
        grid=grid,
        in_specs=[x_spec, eps_spec] + param_specs,
        out_specs=out_spec,
        compiler_params=pltpu.CompilerParams(
            dimension_semantics=("parallel",)),   # batch tiles independent; shardable on v7x
        cost_estimate=cost,
    )(x, eps, *kernel_params)

    dec = packed[:B, :NUM_VARS].astype(jnp.float32)
    mu = packed[:B, NUM_VARS:NUM_VARS + NUM_LATENT].astype(jnp.float32)
    lv = packed[:B, NUM_VARS + NUM_LATENT:NUM_VARS + HEADS_W].astype(jnp.float32)
    return dec, mu, lv


def reference_forward(x, eps, pairs):
    """Pure-JAX f32 reference matching the PyTorch module layer-by-layer."""
    def lin(h, wb):
        w, b = wb
        return h @ w.T + b
    h = x
    for wb in pairs[:3]:
        h = jnp.tanh(lin(h, wb))
    enc = lin(h, pairs[3])
    mu = lin(enc, pairs[4])
    lv = lin(enc, pairs[5])
    z = mu + eps * jnp.exp(0.5 * lv)
    h = z
    for wb in pairs[6:9]:
        h = jnp.tanh(lin(h, wb))
    dec = lin(h, pairs[9])
    return dec, mu, lv


if __name__ == "__main__":
    key = jax.random.PRNGKey(0)
    k_x, k_eps, k_params = jax.random.split(key, 3)

    B = 8
    x = jax.random.normal(k_x, (B, NUM_VARS), jnp.float32)
    # eps for the reparameterization trick (torch.randn_like(std)); drawn
    # deterministically in the wrapper, consumed inside the kernel.
    eps = jax.random.normal(k_eps, (B, NUM_LATENT), jnp.float32)

    pairs = build_params(k_params)
    kernel_params = prepare_kernel_params(pairs)

    dec, mu, lv = jax.block_until_ready(autoencoder_forward(x, eps, kernel_params))

    assert dec.shape == (B, NUM_VARS)
    assert mu.shape == (B, NUM_LATENT)
    assert lv.shape == (B, NUM_LATENT)
    assert bool(jnp.all(jnp.isfinite(dec)))

    # Tolerance check vs. unfolded f32 reference (bf16 matmuls, head folding and
    # bf16 writeback differ only by rounding / reassociation).
    dec_r, mu_r, lv_r = reference_forward(x, eps, pairs)
    assert bool(jnp.allclose(dec, dec_r, atol=0.05, rtol=0.05))
    assert bool(jnp.allclose(mu, mu_r, atol=0.05, rtol=0.05))
    assert bool(jnp.allclose(lv, lv_r, atol=0.05, rtol=0.05))

    print("KERNEL_OK")
</pallas_src>

<mosaic_0001>
module attributes {stable_mosaic.version = 11 : i64} {
  func.func @vae_kernel(%arg0: i32, %arg1: memref<8x64xf32, #tpu.memory_space<vmem>>, %arg2: memref<8x16xf32, #tpu.memory_space<vmem>>, %arg3: memref<32x64xbf16, #tpu.memory_space<vmem>>, %arg4: memref<32x1xf32, #tpu.memory_space<vmem>>, %arg5: memref<32x32xbf16, #tpu.memory_space<vmem>>, %arg6: memref<32x1xf32, #tpu.memory_space<vmem>>, %arg7: memref<32x32xbf16, #tpu.memory_space<vmem>>, %arg8: memref<32x1xf32, #tpu.memory_space<vmem>>, %arg9: memref<32x32xbf16, #tpu.memory_space<vmem>>, %arg10: memref<32x1xf32, #tpu.memory_space<vmem>>, %arg11: memref<32x16xbf16, #tpu.memory_space<vmem>>, %arg12: memref<32x1xf32, #tpu.memory_space<vmem>>, %arg13: memref<32x32xbf16, #tpu.memory_space<vmem>>, %arg14: memref<32x1xf32, #tpu.memory_space<vmem>>, %arg15: memref<32x32xbf16, #tpu.memory_space<vmem>>, %arg16: memref<32x1xf32, #tpu.memory_space<vmem>>, %arg17: memref<64x32xbf16, #tpu.memory_space<vmem>>, %arg18: memref<64x1xf32, #tpu.memory_space<vmem>>, %arg19: memref<8x128xbf16, #tpu.memory_space<vmem>>) attributes {dimension_semantics = [#tpu.dimension_semantics<parallel>], iteration_bounds = array<i64: 1>, scalar_prefetch = 0 : i64, scratch_operands = 0 : i64, tpu.core_type = #tpu.core_type<tc>, window_params = [{transform_indices = @transform_0, window_bounds = array<i64: 8, 64>}, {transform_indices = @transform_1, window_bounds = array<i64: 8, 16>}, {pipeline_mode = #tpu.pipeline_mode<synchronous>, transform_indices = @transform_2, window_bounds = array<i64: 32, 64>}, {pipeline_mode = #tpu.pipeline_mode<synchronous>, transform_indices = @transform_3, window_bounds = array<i64: 32, 1>}, {pipeline_mode = #tpu.pipeline_mode<synchronous>, transform_indices = @transform_4, window_bounds = array<i64: 32, 32>}, {pipeline_mode = #tpu.pipeline_mode<synchronous>, transform_indices = @transform_5, window_bounds = array<i64: 32, 1>}, {pipeline_mode = #tpu.pipeline_mode<synchronous>, transform_indices = @transform_6, window_bounds = array<i64: 32, 32>}, {pipeline_mode = #tpu.pipeline_mode<synchronous>, transform_indices = @transform_7, window_bounds = array<i64: 32, 1>}, {pipeline_mode = #tpu.pipeline_mode<synchronous>, transform_indices = @transform_8, window_bounds = array<i64: 32, 32>}, {pipeline_mode = #tpu.pipeline_mode<synchronous>, transform_indices = @transform_9, window_bounds = array<i64: 32, 1>}, {pipeline_mode = #tpu.pipeline_mode<synchronous>, transform_indices = @transform_10, window_bounds = array<i64: 32, 16>}, {pipeline_mode = #tpu.pipeline_mode<synchronous>, transform_indices = @transform_11, window_bounds = array<i64: 32, 1>}, {pipeline_mode = #tpu.pipeline_mode<synchronous>, transform_indices = @transform_12, window_bounds = array<i64: 32, 32>}, {pipeline_mode = #tpu.pipeline_mode<synchronous>, transform_indices = @transform_13, window_bounds = array<i64: 32, 1>}, {pipeline_mode = #tpu.pipeline_mode<synchronous>, transform_indices = @transform_14, window_bounds = array<i64: 32, 32>}, {pipeline_mode = #tpu.pipeline_mode<synchronous>, transform_indices = @transform_15, window_bounds = array<i64: 32, 1>}, {pipeline_mode = #tpu.pipeline_mode<synchronous>, transform_indices = @transform_16, window_bounds = array<i64: 64, 32>}, {pipeline_mode = #tpu.pipeline_mode<synchronous>, transform_indices = @transform_17, window_bounds = array<i64: 64, 1>}, {transform_indices = @transform_18, window_bounds = array<i64: 8, 128>}]} {
    %c0 = arith.constant 0 : index
    %c0_0 = arith.constant 0 : index
    %0 = vector.load %arg1[%c0, %c0_0] : memref<8x64xf32, #tpu.memory_space<vmem>>, vector<8x64xf32>
    %1 = tpu.transpose %0, [1, 0] : vector<8x64xf32> -> vector<64x8xf32>
    %c0_1 = arith.constant 0 : index
    %c0_2 = arith.constant 0 : index
    %2 = vector.load %arg3[%c0_1, %c0_2] : memref<32x64xbf16, #tpu.memory_space<vmem>>, vector<32x64xbf16>
    %3 = arith.truncf %1 : vector<64x8xf32> to vector<64x8xbf16>
    %cst = arith.constant dense<0.000000e+00> : vector<32x8xf32>
    %4 = tpu.matmul %2, %3, %cst {dimension_numbers = #tpu.dot_dimension_numbers<[1], [0], [0], [1], [0, 0, 1, 1], [], []>} : vector<32x64xbf16>, vector<64x8xbf16>, vector<32x8xf32> -> vector<32x8xf32>
    %c0_3 = arith.constant 0 : index
    %c0_4 = arith.constant 0 : index
    %5 = vector.load %arg4[%c0_3, %c0_4] : memref<32x1xf32, #tpu.memory_space<vmem>>, vector<32x1xf32>
    %6 = vector.broadcast %5 : vector<32x1xf32> to vector<32x8xf32>
    %7 = arith.addf %4, %6 : vector<32x8xf32>
    %8 = math.tanh %7 : vector<32x8xf32>
    %c0_5 = arith.constant 0 : index
    %c0_6 = arith.constant 0 : index
    %9 = vector.load %arg5[%c0_5, %c0_6] : memref<32x32xbf16, #tpu.memory_space<vmem>>, vector<32x32xbf16>
    %10 = arith.truncf %8 : vector<32x8xf32> to vector<32x8xbf16>
    %cst_7 = arith.constant dense<0.000000e+00> : vector<32x8xf32>
    %11 = tpu.matmul %9, %10, %cst_7 {dimension_numbers = #tpu.dot_dimension_numbers<[1], [0], [0], [1], [0, 0, 1, 1], [], []>} : vector<32x32xbf16>, vector<32x8xbf16>, vector<32x8xf32> -> vector<32x8xf32>
    %c0_8 = arith.constant 0 : index
    %c0_9 = arith.constant 0 : index
    %12 = vector.load %arg6[%c0_8, %c0_9] : memref<32x1xf32, #tpu.memory_space<vmem>>, vector<32x1xf32>
    %13 = vector.broadcast %12 : vector<32x1xf32> to vector<32x8xf32>
    %14 = arith.addf %11, %13 : vector<32x8xf32>
    %15 = math.tanh %14 : vector<32x8xf32>
    %c0_10 = arith.constant 0 : index
    %c0_11 = arith.constant 0 : index
    %16 = vector.load %arg7[%c0_10, %c0_11] : memref<32x32xbf16, #tpu.memory_space<vmem>>, vector<32x32xbf16>
    %17 = arith.truncf %15 : vector<32x8xf32> to vector<32x8xbf16>
    %cst_12 = arith.constant dense<0.000000e+00> : vector<32x8xf32>
    %18 = tpu.matmul %16, %17, %cst_12 {dimension_numbers = #tpu.dot_dimension_numbers<[1], [0], [0], [1], [0, 0, 1, 1], [], []>} : vector<32x32xbf16>, vector<32x8xbf16>, vector<32x8xf32> -> vector<32x8xf32>
    %c0_13 = arith.constant 0 : index
    %c0_14 = arith.constant 0 : index
    %19 = vector.load %arg8[%c0_13, %c0_14] : memref<32x1xf32, #tpu.memory_space<vmem>>, vector<32x1xf32>
    %20 = vector.broadcast %19 : vector<32x1xf32> to vector<32x8xf32>
    %21 = arith.addf %18, %20 : vector<32x8xf32>
    %22 = math.tanh %21 : vector<32x8xf32>
    %c0_15 = arith.constant 0 : index
    %c0_16 = arith.constant 0 : index
    %23 = vector.load %arg9[%c0_15, %c0_16] : memref<32x32xbf16, #tpu.memory_space<vmem>>, vector<32x32xbf16>
    %24 = arith.truncf %22 : vector<32x8xf32> to vector<32x8xbf16>
    %cst_17 = arith.constant dense<0.000000e+00> : vector<32x8xf32>
    %25 = tpu.matmul %23, %24, %cst_17 {dimension_numbers = #tpu.dot_dimension_numbers<[1], [0], [0], [1], [0, 0, 1, 1], [], []>} : vector<32x32xbf16>, vector<32x8xbf16>, vector<32x8xf32> -> vector<32x8xf32>
    %c0_18 = arith.constant 0 : index
    %c0_19 = arith.constant 0 : index
    %26 = vector.load %arg10[%c0_18, %c0_19] : memref<32x1xf32, #tpu.memory_space<vmem>>, vector<32x1xf32>
    %27 = vector.broadcast %26 : vector<32x1xf32> to vector<32x8xf32>
    %28 = arith.addf %25, %27 : vector<32x8xf32>
    %29 = vector.extract_strided_slice %28 {offsets = [0, 0], sizes = [16, 8], strides = [1, 1]} : vector<32x8xf32> to vector<16x8xf32>
    %30 = vector.extract_strided_slice %28 {offsets = [16, 0], sizes = [16, 8], strides = [1, 1]} : vector<32x8xf32> to vector<16x8xf32>
    %c0_20 = arith.constant 0 : index
    %c0_21 = arith.constant 0 : index
    %31 = vector.load %arg2[%c0_20, %c0_21] : memref<8x16xf32, #tpu.memory_space<vmem>>, vector<8x16xf32>
    %32 = tpu.transpose %31, [1, 0] : vector<8x16xf32> -> vector<16x8xf32>
    %cst_22 = arith.constant 5.000000e-01 : f32
    %33 = vector.broadcast %cst_22 : f32 to vector<16x8xf32>
    %34 = arith.mulf %33, %30 : vector<16x8xf32>
    %35 = math.exp %34 : vector<16x8xf32>
    %36 = arith.mulf %32, %35 : vector<16x8xf32>
    %37 = arith.addf %29, %36 : vector<16x8xf32>
    %c0_23 = arith.constant 0 : index
    %c0_24 = arith.constant 0 : index
    %38 = vector.load %arg11[%c0_23, %c0_24] : memref<32x16xbf16, #tpu.memory_space<vmem>>, vector<32x16xbf16>
    %39 = arith.truncf %37 : vector<16x8xf32> to vector<16x8xbf16>
    %cst_25 = arith.constant dense<0.000000e+00> : vector<32x8xf32>
    %40 = tpu.matmul %38, %39, %cst_25 {dimension_numbers = #tpu.dot_dimension_numbers<[1], [0], [0], [1], [0, 0, 1, 1], [], []>} : vector<32x16xbf16>, vector<16x8xbf16>, vector<32x8xf32> -> vector<32x8xf32>
    %c0_26 = arith.constant 0 : index
    %c0_27 = arith.constant 0 : index
    %41 = vector.load %arg12[%c0_26, %c0_27] : memref<32x1xf32, #tpu.memory_space<vmem>>, vector<32x1xf32>
    %42 = vector.broadcast %41 : vector<32x1xf32> to vector<32x8xf32>
    %43 = arith.addf %40, %42 : vector<32x8xf32>
    %44 = math.tanh %43 : vector<32x8xf32>
    %c0_28 = arith.constant 0 : index
    %c0_29 = arith.constant 0 : index
    %45 = vector.load %arg13[%c0_28, %c0_29] : memref<32x32xbf16, #tpu.memory_space<vmem>>, vector<32x32xbf16>
    %46 = arith.truncf %44 : vector<32x8xf32> to vector<32x8xbf16>
    %cst_30 = arith.constant dense<0.000000e+00> : vector<32x8xf32>
    %47 = tpu.matmul %45, %46, %cst_30 {dimension_numbers = #tpu.dot_dimension_numbers<[1], [0], [0], [1], [0, 0, 1, 1], [], []>} : vector<32x32xbf16>, vector<32x8xbf16>, vector<32x8xf32> -> vector<32x8xf32>
    %c0_31 = arith.constant 0 : index
    %c0_32 = arith.constant 0 : index
    %48 = vector.load %arg14[%c0_31, %c0_32] : memref<32x1xf32, #tpu.memory_space<vmem>>, vector<32x1xf32>
    %49 = vector.broadcast %48 : vector<32x1xf32> to vector<32x8xf32>
    %50 = arith.addf %47, %49 : vector<32x8xf32>
    %51 = math.tanh %50 : vector<32x8xf32>
    %c0_33 = arith.constant 0 : index
    %c0_34 = arith.constant 0 : index
    %52 = vector.load %arg15[%c0_33, %c0_34] : memref<32x32xbf16, #tpu.memory_space<vmem>>, vector<32x32xbf16>
    %53 = arith.truncf %51 : vector<32x8xf32> to vector<32x8xbf16>
    %cst_35 = arith.constant dense<0.000000e+00> : vector<32x8xf32>
    %54 = tpu.matmul %52, %53, %cst_35 {dimension_numbers = #tpu.dot_dimension_numbers<[1], [0], [0], [1], [0, 0, 1, 1], [], []>} : vector<32x32xbf16>, vector<32x8xbf16>, vector<32x8xf32> -> vector<32x8xf32>
    %c0_36 = arith.constant 0 : index
    %c0_37 = arith.constant 0 : index
    %55 = vector.load %arg16[%c0_36, %c0_37] : memref<32x1xf32, #tpu.memory_space<vmem>>, vector<32x1xf32>
    %56 = vector.broadcast %55 : vector<32x1xf32> to vector<32x8xf32>
    %57 = arith.addf %54, %56 : vector<32x8xf32>
    %58 = math.tanh %57 : vector<32x8xf32>
    %c0_38 = arith.constant 0 : index
    %c0_39 = arith.constant 0 : index
    %59 = vector.load %arg17[%c0_38, %c0_39] : memref<64x32xbf16, #tpu.memory_space<vmem>>, vector<64x32xbf16>
    %60 = arith.truncf %58 : vector<32x8xf32> to vector<32x8xbf16>
    %cst_40 = arith.constant dense<0.000000e+00> : vector<64x8xf32>
    %61 = tpu.matmul %59, %60, %cst_40 {dimension_numbers = #tpu.dot_dimension_numbers<[1], [0], [0], [1], [0, 0, 1, 1], [], []>} : vector<64x32xbf16>, vector<32x8xbf16>, vector<64x8xf32> -> vector<64x8xf32>
    %c0_41 = arith.constant 0 : index
    %c0_42 = arith.constant 0 : index
    %62 = vector.load %arg18[%c0_41, %c0_42] : memref<64x1xf32, #tpu.memory_space<vmem>>, vector<64x1xf32>
    %63 = vector.broadcast %62 : vector<64x1xf32> to vector<64x8xf32>
    %64 = arith.addf %61, %63 : vector<64x8xf32>
    %cst_43 = arith.constant 0.000000e+00 : f32
    %65 = vector.broadcast %cst_43 : f32 to vector<32x8xf32>
    %66 = tpu.concatenate %64, %28, %65 in 0 : vector<64x8xf32>, vector<32x8xf32>, vector<32x8xf32> -> vector<128x8xf32>
    %67 = tpu.transpose %66, [1, 0] : vector<128x8xf32> -> vector<8x128xf32>
    %68 = arith.truncf %67 : vector<8x128xf32> to vector<8x128xbf16>
    %c0_44 = arith.constant 0 : index
    %c0_45 = arith.constant 0 : index
    %69 = vector.load %arg19[%c0_44, %c0_45] : memref<8x128xbf16, #tpu.memory_space<vmem>>, vector<8x128xbf16>
    tpu.vector_store %arg19[%c0_44, %c0_45], %68 {strides = array<i32>} : memref<8x128xbf16, #tpu.memory_space<vmem>>, vector<8x128xbf16>,
    return
  }
  func.func @transform_0(%arg0: i32) -> (i32, i32) {
    %c0_i32 = arith.constant 0 : i32
    %c0_i32_0 = arith.constant 0 : i32
    return %arg0, %c0_i32 : i32, i32
  }
  func.func @transform_1(%arg0: i32) -> (i32, i32) {
    %c0_i32 = arith.constant 0 : i32
    %c0_i32_0 = arith.constant 0 : i32
    return %arg0, %c0_i32 : i32, i32
  }
  func.func @transform_2(%arg0: i32) -> (i32, i32) {
    %c0_i32 = arith.constant 0 : i32
    %c0_i32_0 = arith.constant 0 : i32
    %c0_i32_1 = arith.constant 0 : i32
    return %c0_i32, %c0_i32_0 : i32, i32
  }
  func.func @transform_3(%arg0: i32) -> (i32, i32) {
    %c0_i32 = arith.constant 0 : i32
    %c0_i32_0 = arith.constant 0 : i32
    %c0_i32_1 = arith.constant 0 : i32
    return %c0_i32, %c0_i32_0 : i32, i32
  }
  func.func @transform_4(%arg0: i32) -> (i32, i32) {
    %c0_i32 = arith.constant 0 : i32
    %c0_i32_0 = arith.constant 0 : i32
    %c0_i32_1 = arith.constant 0 : i32
    return %c0_i32, %c0_i32_0 : i32, i32
  }
  func.func @transform_5(%arg0: i32) -> (i32, i32) {
    %c0_i32 = arith.constant 0 : i32
    %c0_i32_0 = arith.constant 0 : i32
    %c0_i32_1 = arith.constant 0 : i32
    return %c0_i32, %c0_i32_0 : i32, i32
  }
  func.func @transform_6(%arg0: i32) -> (i32, i32) {
    %c0_i32 = arith.constant 0 : i32
    %c0_i32_0 = arith.constant 0 : i32
    %c0_i32_1 = arith.constant 0 : i32
    return %c0_i32, %c0_i32_0 : i32, i32
  }
  func.func @transform_7(%arg0: i32) -> (i32, i32) {
    %c0_i32 = arith.constant 0 : i32
    %c0_i32_0 = arith.constant 0 : i32
    %c0_i32_1 = arith.constant 0 : i32
    return %c0_i32, %c0_i32_0 : i32, i32
  }
  func.func @transform_8(%arg0: i32) -> (i32, i32) {
    %c0_i32 = arith.constant 0 : i32
    %c0_i32_0 = arith.constant 0 : i32
    %c0_i32_1 = arith.constant 0 : i32
    return %c0_i32, %c0_i32_0 : i32, i32
  }
  func.func @transform_9(%arg0: i32) -> (i32, i32) {
    %c0_i32 = arith.constant 0 : i32
    %c0_i32_0 = arith.constant 0 : i32
    %c0_i32_1 = arith.constant 0 : i32
    return %c0_i32, %c0_i32_0 : i32, i32
  }
  func.func @transform_10(%arg0: i32) -> (i32, i32) {
    %c0_i32 = arith.constant 0 : i32
    %c0_i32_0 = arith.constant 0 : i32
    %c0_i32_1 = arith.constant 0 : i32
    return %c0_i32, %c0_i32_0 : i32, i32
  }
  func.func @transform_11(%arg0: i32) -> (i32, i32) {
    %c0_i32 = arith.constant 0 : i32
    %c0_i32_0 = arith.constant 0 : i32
    %c0_i32_1 = arith.constant 0 : i32
    return %c0_i32, %c0_i32_0 : i32, i32
  }
  func.func @transform_12(%arg0: i32) -> (i32, i32) {
    %c0_i32 = arith.constant 0 : i32
    %c0_i32_0 = arith.constant 0 : i32
    %c0_i32_1 = arith.constant 0 : i32
    return %c0_i32, %c0_i32_0 : i32, i32
  }
  func.func @transform_13(%arg0: i32) -> (i32, i32) {
    %c0_i32 = arith.constant 0 : i32
    %c0_i32_0 = arith.constant 0 : i32
    %c0_i32_1 = arith.constant 0 : i32
    return %c0_i32, %c0_i32_0 : i32, i32
  }
  func.func @transform_14(%arg0: i32) -> (i32, i32) {
    %c0_i32 = arith.constant 0 : i32
    %c0_i32_0 = arith.constant 0 : i32
    %c0_i32_1 = arith.constant 0 : i32
    return %c0_i32, %c0_i32_0 : i32, i32
  }
  func.func @transform_15(%arg0: i32) -> (i32, i32) {
    %c0_i32 = arith.constant 0 : i32
    %c0_i32_0 = arith.constant 0 : i32
    %c0_i32_1 = arith.constant 0 : i32
    return %c0_i32, %c0_i32_0 : i32, i32
  }
  func.func @transform_16(%arg0: i32) -> (i32, i32) {
    %c0_i32 = arith.constant 0 : i32
    %c0_i32_0 = arith.constant 0 : i32
    %c0_i32_1 = arith.constant 0 : i32
    return %c0_i32, %c0_i32_0 : i32, i32
  }
  func.func @transform_17(%arg0: i32) -> (i32, i32) {
    %c0_i32 = arith.constant 0 : i32
    %c0_i32_0 = arith.constant 0 : i32
    %c0_i32_1 = arith.constant 0 : i32
    return %c0_i32, %c0_i32_0 : i32, i32
  }
  func.func @transform_18(%arg0: i32) -> (i32, i32) {
    %c0_i32 = arith.constant 0 : i32
    %c0_i32_0 = arith.constant 0 : i32
    return %arg0, %c0_i32 : i32, i32
  }
}

</mosaic_0001>

<bundles_post_ra>
// kernel: tpu_custom_call.1
= control target key start
LH: loop header
LB: loop body
LE: loop exit
PB: predicated region body
PF: predicated region fallthrough
CT: control target
= control target key end

     0   :  { %s1584_s0 = inlined_call_operand.vmem [shape: f32[8,64], index: 0, kind: input, shape index: {}]   ;;  %s1585_s1 = inlined_call_operand.vmem [shape: f32[8,16], index: 1, kind: input, shape index: {}]   ;;  %s1586_s2 = inlined_call_operand.vmem [shape: bf16[32,64], index: 2, kind: input, shape index: {}]   ;;  %s1587_s3 = inlined_call_operand.vmem [shape: f32[32,1], index: 3, kind: input, shape index: {}]   ;;  %s1588_s4 = inlined_call_operand.vmem [shape: bf16[32,32], index: 4, kind: input, shape index: {}]   ;;  %s1589_s5 = inlined_call_operand.vmem [shape: f32[32,1], index: 5, kind: input, shape index: {}]   ;;  %s1590_s6 = inlined_call_operand.vmem [shape: bf16[32,32], index: 6, kind: input, shape index: {}]   ;;  %s1591_s7 = inlined_call_operand.vmem [shape: f32[32,1], index: 7, kind: input, shape index: {}]   ;;  %s1592_s8 = inlined_call_operand.vmem [shape: bf16[32,32], index: 8, kind: input, shape index: {}]   ;;  %s1593_s9 = inlined_call_operand.vmem [shape: f32[32,1], index: 9, kind: input, shape index: {}]   ;;  %s1594_s10 = inlined_call_operand.vmem [shape: bf16[32,16], index: 10, kind: input, shape index: {}]   ;;  %s1595_s11 = inlined_call_operand.vmem [shape: f32[32,1], index: 11, kind: input, shape index: {}]   ;;  %s1596_s12 = inlined_call_operand.vmem [shape: bf16[32,32], index: 12, kind: input, shape index: {}]   ;;  %s1597_s13 = inlined_call_operand.vmem [shape: f32[32,1], index: 13, kind: input, shape index: {}]   ;;  %s1598_s14 = inlined_call_operand.vmem [shape: bf16[32,32], index: 14, kind: input, shape index: {}]   ;;  %s1599_s15 = inlined_call_operand.vmem [shape: f32[32,1], index: 15, kind: input, shape index: {}]   ;;  %s1600_s16 = inlined_call_operand.vmem [shape: bf16[64,32], index: 16, kind: input, shape index: {}]   ;;  %s1601_s17 = inlined_call_operand.vmem [shape: f32[64,1], index: 17, kind: input, shape index: {}]   ;;  %s1602_s18 = inlined_call_operand.hbm [shape: bf16[8,128], index: 18, kind: output, shape index: {}]  }
   0x1   :  { %1604 = sst [smem:[#allocation5_spill]] %s1584_s0 }
   0x2   :  { %1605 = sst [smem:[#allocation6_spill]] %s1585_s1 }
   0x3   :  { %1606 = sst [smem:[#allocation7_spill]] %s1586_s2 }
   0x4   :  { %s1607_s29 = sld [smem:[#allocation5_spill]]  ;;  %v103_v1 = vld [vmem:[%s1587_s3 + $0x8] sm:$0xff]  ;;  %v1273_v2 = vmov 0   ;;  %v104_v3 = vld [vmem:[%s1587_s3 + $0x10] sm:$0xff]  ;;  %v105_v4 = vld [vmem:[%s1587_s3 + $0x18] sm:$0xff] }
   0x5   :  { %1178 = vset.pattern.permute.xlu1 %v1273_v2  ;;  %v202_v5 = vld [vmem:[%s1589_s5] sm:$0xff]  ;;  %v203_v6 = vld [vmem:[%s1589_s5 + $0x8] sm:$0xff] }
   0x6   :  { %113 = vperm.xlu1 %1178, %v103_v1  }
   0xa   :  { %v61_v0 = vld [vmem:[%s1607_s29] sm:$0xff]  ;;  %118 = vperm.xlu1 %1178, %v104_v3  }
   0xb   :  { %62 = vxpose.xlu0.b32.start.end [1/1] (short) (narrow) %v61_v0, 64 }
   0xe   :  { %123 = vperm.xlu1 %1178, %v105_v4  }
  0x12   :  { %208 = vperm.xlu1 %1178, %v202_v5  }
  0x13   :  { %23 = vsyncpa [#allocation3], 0  ;;  %v204_v7 = vld [vmem:[%s1589_s5 + $0x10] sm:$0xff]  ;;  %v205_v8 = vld [vmem:[%s1589_s5 + $0x18] sm:$0xff]  ;;  %s1608_s21 = sld [smem:[#allocation7_spill]]  ;;  %vm136_vm0 = vcmask 523264  }
  0x14   :  { %v302_v9 = vld [vmem:[%s1591_s7] sm:$0xff]  ;;  %v303_v10 = vld [vmem:[%s1591_s7 + $0x8] sm:$0xff]  ;;  %v304_v12 = vld [vmem:[%s1591_s7 + $0x10] sm:$0xff]  ;;  %vm236_vm1 = vcmask 261120   ;;  %vm572_vm2 = vcmask 130048  }
  0x15   :  { %v305_v13 = vld [vmem:[%s1591_s7 + $0x18] sm:$0xff]  ;;  %v403_v14 = vld [vmem:[%s1593_s9 + $0x10] sm:$0xff]  ;;  %v401_v16 = vld [vmem:[%s1593_s9] sm:$0xff]  ;;  %s1609_s7 = sld [smem:[#allocation6_spill]] }
  0x16   :  { %213 = vperm.xlu1 %1178, %v203_v6   ;;  %v404_v15 = vld [vmem:[%s1593_s9 + $0x18] sm:$0xff]  ;;  %v402_v17 = vld [vmem:[%s1593_s9 + $0x8] sm:$0xff]  ;;  %v102_v18 = vld [vmem:[%s1587_s3] sm:$0xff] }
  0x17   :  { %v538_v19 = vld [vmem:[%s1595_s11] sm:$0xff]  ;;  %v539_v20 = vld [vmem:[%s1595_s11 + $0x8] sm:$0xff]  ;;  %v540_v21 = vld [vmem:[%s1595_s11 + $0x10] sm:$0xff] }
  0x18   :  { %v541_v22 = vld [vmem:[%s1595_s11 + $0x18] sm:$0xff]  ;;  %v638_v23 = vld [vmem:[%s1597_s13] sm:$0xff]  ;;  %v639_v24 = vld [vmem:[%s1597_s13 + $0x8] sm:$0xff] }
  0x19   :  { %v1179_v11 = vld [vmem:[%s1608_s21] sm:$0xff]   ;;  %v640_v25 = vld [vmem:[%s1597_s13 + $0x10] sm:$0xff]  ;;  %v641_v27 = vld [vmem:[%s1597_s13 + $0x18] sm:$0xff] }
  0x1a   :  { %218 = vperm.xlu1 %1178, %v204_v7   ;;  %1112 = vmatprep.mubr.msk.bf16.mxu0 %vm136_vm0, %v1179_v11  ;;  %v738_v28 = vld [vmem:[%s1599_s15 + $0x8] sm:$0xff]  ;;  %v739_v29 = vld [vmem:[%s1599_s15 + $0x10] sm:$0xff]  ;;  %v740_v30 = vld [vmem:[%s1599_s15 + $0x18] sm:$0xff] }
  0x1b   :  { %v490_v26 = vld [vmem:[%s1609_s7] sm:$0xff]  ;;  %v841_v32 = vld [vmem:[%s1601_s17 + $0x8] sm:$0xff]  ;;  %v842_v33 = vld [vmem:[%s1601_s17 + $0x10] sm:$0xff] }
  0x1c   :  { %v840_v31 = vld [vmem:[%s1601_s17] sm:$0xff]  ;;  %v843_v34 = vld [vmem:[%s1601_s17 + $0x18] sm:$0xff]  ;;  %v845_v40 = vld [vmem:[%s1601_s17 + $0x28] sm:$0xff] }
  0x1d   :  { %v737_v36 = vld [vmem:[%s1599_s15] sm:$0xff]  ;;  %v846_v41 = vld [vmem:[%s1601_s17 + $0x30] sm:$0xff]  ;;  %v847_v43 = vld [vmem:[%s1601_s17 + $0x38] sm:$0xff] }
  0x1e   :  { %223 = vperm.xlu1 %1178, %v205_v8   ;;  %v844_v37 = vld [vmem:[%s1601_s17 + $0x20] sm:$0xff]  ;;  %v1180_v52 = vld [vmem:[%s1608_s21 + $0x8] sm:$0xff]  }
  0x1f   :  { %v1181_v53 = vld [vmem:[%s1588_s4] sm:$0xff]   ;;  %v1182_v8 = vld [vmem:[%s1588_s4 + $0x8] sm:$0xff]  }
  0x20   :  { %1120 = vmatprep.mubr.msk.bf16.mxu1 %vm236_vm1, %v1181_v53 }
  0x22   :  { %308 = vperm.xlu1 %1178, %v302_v9   ;;  %v1183_v9 = vld [vmem:[%s1590_s6] sm:$0xff]  }
  0x26   :  { %313 = vperm.xlu1 %1178, %v303_v10  }
  0x2a   :  { %318 = vperm.xlu1 %1178, %v304_v12  }
  0x2e   :  { %323 = vperm.xlu1 %1178, %v305_v13  }
  0x32   :  { %417 = vperm.xlu1 %1178, %v403_v14  }
  0x34   :  { %1177 = vset.pattern.permute.xlu0 %v1273_v2 }
  0x36   :  { %422 = vperm.xlu1 %1178, %v404_v15  }
  0x3a   :  { %407 = vperm.xlu1 %1178, %v401_v16  }
  0x3e   :  { %412 = vperm.xlu1 %1178, %v402_v17  }
  0x50   :  { %108 = vperm.xlu0 %1177, %v102_v18  }
  0x54   :  { %544 = vperm.xlu0 %1177, %v538_v19  }
  0x58   :  { %549 = vperm.xlu0 %1177, %v539_v20  }
  0x5c   :  { %554 = vperm.xlu0 %1177, %v540_v21  }
  0x60   :  { %559 = vperm.xlu0 %1177, %v541_v22  }
  0x64   :  { %644 = vperm.xlu0 %1177, %v638_v23  }
  0x67   :  { %491 = vxpose.xlu1.b32.start.end [1/1] (short) (narrow) %v490_v26, 16 }
  0x68   :  { %649 = vperm.xlu0 %1177, %v639_v24  }
  0x6c   :  { %654 = vperm.xlu0 %1177, %v640_v25  }
  0x70   :  { %659 = vperm.xlu0 %1177, %v641_v27  }
  0x74   :  { %748 = vperm.xlu0 %1177, %v738_v28   ;;  %v1184_v28 = vld [vmem:[%s1590_s6 + $0x8] sm:$0xff]  }
  0x78   :  { %753 = vperm.xlu0 %1177, %v739_v29   ;;  %v1185_v29 = vld [vmem:[%s1592_s8] sm:$0xff]  }
  0x7c   :  { %758 = vperm.xlu0 %1177, %v740_v30  }
  0x80   :  { %850 = vperm.xlu0 %1177, %v840_v31  }
  0x84   :  { %855 = vperm.xlu0 %1177, %v841_v32  }
  0x85   :  { %v114_v54 = vpop.permute.xlu1 %113 }
  0x88   :  { %860 = vperm.xlu0 %1177, %v842_v33  }
  0x89   :  { %743 = vperm.xlu1 %1178, %v737_v36   ;;  %v119_v55 = vpop.permute.xlu1 %118 }
  0x8b   :  { %v78_v35 = vpop.trf.xlu0 }
  0x8c   :  { %865 = vperm.xlu0 %1177, %v843_v34  }
  0x8d   :  { %875 = vperm.xlu1 %1178, %v845_v40   ;;  %v124_v60 = vpop.permute.xlu1 %123 }
  0x8f   :  { %v79_v38 = vpop.trf.xlu0 }
  0x90   :  { %v98_v39 = vpack.c.bf16 %v79_v38, %v78_v35  ;;  %870 = vperm.xlu0 %1177, %v844_v37  }
  0x91   :  { %885 = vperm.xlu1 %1178, %v847_v43   ;;  %v209_v10 = vpop.permute.xlu1 %208 }
  0x92   :  { %1104 = vmatprep.subr.bf16.mxu0 %v98_v39 }
  0x93   :  { %1105 = vmatpush3.bf16.msra.mxu0 %v98_v39  ;;  %v80_v42 = vpop.trf.xlu0 }
  0x94   :  { %880 = vperm.xlu0 %1177, %v846_v41  }
  0x95   :  { %v214_v11 = vpop.permute.xlu1 %213 }
  0x97   :  { %v81_v44 = vpop.trf.xlu0 }
  0x98   :  { %v99_v45 = vpack.c.bf16 %v81_v44, %v80_v42 }
  0x99   :  { %v219_v12 = vpop.permute.xlu1 %218 }
  0x9a   :  { %1106 = vmatprep.subr.bf16.mxu0 %v99_v45 }
  0x9b   :  { %1107 = vmatpush3.bf16.msra.mxu0 %v99_v45  ;;  %v82_v46 = vpop.trf.xlu0 }
  0x9d   :  { %v224_v16 = vpop.permute.xlu1 %223 }
  0x9f   :  { %v83_v47 = vpop.trf.xlu0 }
  0xa0   :  { %v100_v48 = vpack.c.bf16 %v83_v47, %v82_v46 }
  0xa1   :  { %v309_v30 = vpop.permute.xlu1 %308 }
  0xa2   :  { %1108 = vmatprep.subr.bf16.mxu0 %v100_v48 }
  0xa3   :  { %1109 = vmatpush3.bf16.msra.mxu0 %v100_v48  ;;  %v84_v49 = vpop.trf.xlu0  ;;  %v1186_v48 = vld [vmem:[%s1592_s8 + $0x8] sm:$0xff]  }
  0xa5   :  { %v314_v31 = vpop.permute.xlu1 %313 }
  0xa7   :  { %v85_v50 = vpop.trf.xlu0 }
  0xa8   :  { %v101_v51 = vpack.c.bf16 %v85_v50, %v84_v49  ;;  %v1187_v49 = vld [vmem:[%s1594_s10] sm:$0xff]  }
  0xa9   :  { %v319_v32 = vpop.permute.xlu1 %318 }
  0xaa   :  { %1110 = vmatprep.subr.bf16.mxu0 %v101_v51 }
  0xab   :  { %1111 = vmatpush3.bf16.msra.mxu0 %v101_v51 }
  0xad   :  { %v324_v36 = vpop.permute.xlu1 %323 }
  0xae   :  { %1113 = vmatmul.mubr.msk.bf16.vlgmr.msra.gmra.mrb[0].mxu0 %vm136_vm0, %v1180_v52 }
  0xb1   :  { %v418_v50 = vpop.permute.xlu1 %417 }
  0xb5   :  { %v423_v51 = vpop.permute.xlu1 %422 }
  0xb9   :  { %v408_v53 = vpop.permute.xlu1 %407 }
  0xcf   :  { %v109_v57 = vpop.permute.xlu0 %108 }
 0x181   :  { %v1114_v56 = vpop.f32.mrb[0].mxu0 }
 0x182   :  { %v186_v58 = vadd.f32 %v1114_v56, %v119_v55  ;;  %v177_v59 = vpop.f32.mrb[1].mxu0 }
 0x183   :  { %v178_v61 = vadd.f32 %v177_v59, %v109_v57  ;;  %v1115_v62 = vpop.f32.mrb[2].mxu0 }
 0x184   :  { %1197 = vtanh.f32 %v186_v58  ;;  %v189_v63 = vadd.f32 %v1115_v62, %v124_v60  ;;  %v180_v0 = vpop.f32.mrb[3].mxu0  ;;  %v413_v62 = vpop.permute.xlu1 %412 }
 0x185   :  { %1199 = vtanh.f32 %v178_v61  ;;  %v181_v1 = vadd.f32 %v180_v0, %v114_v54 }
 0x186   :  { %1201 = vtanh.f32 %v189_v63 }
 0x187   :  { %1203 = vtanh.f32 %v181_v1 }
 0x188   :  { %v507_v0 = vpop.trf.xlu1 }
 0x18e   :  { %v1198_v2 = vpop.eup %1197 }
 0x18f   :  { %v1200_v3 = vpop.eup %1199 }
 0x190   :  { %v1202_v4 = vpop.eup %1201 }
 0x191   :  { %v1204_v5 = vpop.eup %1203  ;;  %v201_v6 = vpack.c.bf16 %v1202_v4, %v1198_v2  ;;  %v508_v4 = vpop.trf.xlu1 }
 0x192   :  { %v200_v7 = vpack.c.bf16 %v1204_v5, %v1200_v3 }
 0x194   :  { %1116 = vmatprep.subr.bf16.mxu1 %v200_v7 }
 0x195   :  { %1117 = vmatpush3.bf16.msra.mxu1 %v200_v7 }
 0x196   :  { %1118 = vmatprep.subr.bf16.mxu1 %v201_v6 }
 0x199   :  { %1119 = vmatpush3.bf16.msra.mxu1 %v201_v6 }
 0x19c   :  { %1121 = vmatmul.mubr.msk.bf16.vlgmr.msra.gmra.mrb[0].mxu1 %vm236_vm1, %v1182_v8 }
 0x19d   :  { %1128 = vmatprep.mubr.msk.bf16.mxu1 %vm236_vm1, %v1183_v9 }
 0x26f   :  { %v1122_v13 = vpop.f32.mrb[0].mxu1 }
 0x270   :  { %v286_v14 = vadd.f32 %v1122_v13, %v219_v12  ;;  %v277_v15 = vpop.f32.mrb[1].mxu1  ;;  %v1189_v12 = vld [vmem:[%s1596_s12] sm:$0xff]   ;;  %v545_v13 = vpop.permute.xlu0 %544 }
 0x271   :  { %v278_v17 = vadd.f32 %v277_v15, %v209_v10  ;;  %v1123_v18 = vpop.f32.mrb[2].mxu1  ;;  %1150 = vmatprep.mubr.msk.bf16.mxu0 %vm236_vm1, %v1189_v12  ;;  %v1195_v12 = vld [vmem:[%s1600_s16 + $0x10] sm:$0xff]  }
 0x272   :  { %1205 = vtanh.f32 %v286_v14  ;;  %v289_v19 = vadd.f32 %v1123_v18, %v224_v16  ;;  %v280_v20 = vpop.f32.mrb[3].mxu1 }
 0x273   :  { %1207 = vtanh.f32 %v278_v17  ;;  %v281_v21 = vadd.f32 %v280_v20, %v214_v11  ;;  %v1188_v11 = vld [vmem:[%s1594_s10 + $0x8] sm:$0xff]  }
 0x274   :  { %1209 = vtanh.f32 %v289_v19  ;;  %v550_v14 = vpop.permute.xlu0 %549 }
 0x275   :  { %1211 = vtanh.f32 %v281_v21 }
 0x278   :  { %v555_v15 = vpop.permute.xlu0 %554 }
 0x27c   :  { %v1206_v22 = vpop.eup %1205  ;;  %v560_v19 = vpop.permute.xlu0 %559 }
 0x27d   :  { %v1208_v23 = vpop.eup %1207 }
 0x27e   :  { %v1210_v24 = vpop.eup %1209 }
 0x27f   :  { %v1212_v25 = vpop.eup %1211  ;;  %v301_v26 = vpack.c.bf16 %v1210_v24, %v1206_v22 }
 0x280   :  { %v300_v27 = vpack.c.bf16 %v1212_v25, %v1208_v23 }
 0x282   :  { %1124 = vmatprep.subr.bf16.mxu1 %v300_v27 }
 0x283   :  { %1125 = vmatpush3.bf16.msra.mxu1 %v300_v27 }
 0x284   :  { %1126 = vmatprep.subr.bf16.mxu1 %v301_v26 }
 0x287   :  { %1127 = vmatpush3.bf16.msra.mxu1 %v301_v26 }
 0x28a   :  { %1129 = vmatmul.mubr.msk.bf16.vlgmr.msra.gmra.mrb[4].mxu1 %vm236_vm1, %v1184_v28 }
 0x28b   :  { %1136 = vmatprep.mubr.msk.bf16.mxu1 %vm236_vm1, %v1185_v29 }
 0x35d   :  { %v1130_v33 = vpop.f32.mrb[4].mxu1 }
 0x35e   :  { %v385_v34 = vadd.f32 %v1130_v33, %v319_v32  ;;  %v376_v35 = vpop.f32.mrb[5].mxu1  ;;  %v1191_v32 = vld [vmem:[%s1598_s14] sm:$0xff]   ;;  %v645_v33 = vpop.permute.xlu0 %644 }
 0x35f   :  { %v377_v37 = vadd.f32 %v376_v35, %v309_v30  ;;  %v1131_v38 = vpop.f32.mrb[6].mxu1 }
 0x360   :  { %1213 = vtanh.f32 %v385_v34  ;;  %v388_v39 = vadd.f32 %v1131_v38, %v324_v36  ;;  %v379_v40 = vpop.f32.mrb[7].mxu1 }
 0x361   :  { %1215 = vtanh.f32 %v377_v37  ;;  %v380_v41 = vadd.f32 %v379_v40, %v314_v31  ;;  %v1190_v31 = vld [vmem:[%s1596_s12 + $0x8] sm:$0xff]  }
 0x362   :  { %1217 = vtanh.f32 %v388_v39  ;;  %v650_v34 = vpop.permute.xlu0 %649 }
 0x363   :  { %1219 = vtanh.f32 %v380_v41 }
 0x366   :  { %v655_v35 = vpop.permute.xlu0 %654 }
 0x36a   :  { %v1214_v42 = vpop.eup %1213  ;;  %v660_v39 = vpop.permute.xlu0 %659 }
 0x36b   :  { %v1216_v43 = vpop.eup %1215 }
 0x36c   :  { %v1218_v44 = vpop.eup %1217 }
 0x36d   :  { %v1220_v45 = vpop.eup %1219  ;;  %v400_v46 = vpack.c.bf16 %v1218_v44, %v1214_v42 }
 0x36e   :  { %v399_v47 = vpack.c.bf16 %v1220_v45, %v1216_v43 }
 0x370   :  { %1132 = vmatprep.subr.bf16.mxu1 %v399_v47 }
 0x371   :  { %1133 = vmatpush3.bf16.msra.mxu1 %v399_v47 }
 0x372   :  { %1134 = vmatprep.subr.bf16.mxu1 %v400_v46 }
 0x375   :  { %1135 = vmatpush3.bf16.msra.mxu1 %v400_v46 }
 0x378   :  { %1137 = vmatmul.mubr.msk.bf16.vlgmr.msra.gmra.mrb[8].mxu1 %vm236_vm1, %v1186_v48 }
 0x379   :  { %1142 = vmatprep.mubr.msk.bf16.mxu1 %vm572_vm2, %v1187_v49 }
 0x44b   :  { %v1138_v52 = vpop.f32.mrb[8].mxu1 }
 0x44c   :  { %v1520_v54 = vadd.f32 %v1138_v52, %v418_v50  ;;  %v475_v55 = vpop.f32.mrb[9].mxu1  ;;  %v1193_v52 = vld [vmem:[%s1600_s16] sm:$0xff]  }
 0x44d   :  { %v1139_v56 = vpop.f32.mrb[10].mxu1  ;;  %v1526_v5 = vadd.f32 %v475_v55, %v408_v53  ;;  %v749_v53 = vpop.permute.xlu0 %748 }
 0x44e   :  { %v523_v57 = vmul.f32 0.5, %v1520_v54  ;;  %v1523_v58 = vadd.f32 %v1139_v56, %v423_v51  ;;  %v478_v59 = vpop.f32.mrb[11].mxu1  ;;  %v1192_v51 = vld [vmem:[%s1598_s14 + $0x8] sm:$0xff]  }
 0x44f   :  { %v1528_v6 = vadd.f32 %v478_v59, %v413_v62 }
 0x450   :  { %v525_v60 = vmul.f32 1.442695, %v523_v57  ;;  %v524_v61 = vmul.f32 0.5, %v1523_v58  ;;  %v744_v57 = vpop.permute.xlu1 %743 }
 0x451   :  { %v754_v55 = vpop.permute.xlu0 %753 }
 0x452   :  { %1221 = vpow2.f32 %v525_v60  ;;  %v527_v63 = vmul.f32 1.442695, %v524_v61 }
 0x454   :  { %1223 = vpow2.f32 %v527_v63 }
 0x455   :  { %v759_v61 = vpop.permute.xlu0 %758 }
 0x45c   :  { %v1222_v1 = vpop.eup %1221 }
 0x45d   :  { %v529_v2 = vmul.f32 %v1222_v1, %v507_v0 }
 0x45e   :  { %v1224_v3 = vpop.eup %1223 }
 0x45f   :  { %v530_v7 = vmul.f32 %v1224_v3, %v508_v4  ;;  %v531_v8 = vadd.f32 %v529_v2, %v1526_v5 }
 0x461   :  { %v532_v9 = vadd.f32 %v530_v7, %v1528_v6 }
 0x463   :  { %v537_v10 = vpack.c.bf16 %v532_v9, %v531_v8 }
 0x465   :  { %1140 = vmatprep.subr.bf16.mxu1 %v537_v10 }
 0x466   :  { %1141 = vmatpush3.bf16.msra.mxu1 %v537_v10 }
 0x469   :  { %1143 = vmatmul.mubr.msk.bf16.vlgmr.msra.gmra.mrb[12].mxu1 %vm572_vm2, %v1188_v11  ;;  %v1194_v11 = vld [vmem:[%s1600_s16 + $0x8] sm:$0xff]  }
 0x46a   :  { %1158 = vmatprep.mubr.msk.bf16.mxu1 %vm236_vm1, %v1191_v32  ;;  %v876_v32 = vpop.permute.xlu1 %875 }
 0x53c   :  { %v1144_v16 = vpop.f32.mrb[12].mxu1 }
 0x53d   :  { %v622_v17 = vadd.f32 %v1144_v16, %v555_v15  ;;  %v613_v18 = vpop.f32.mrb[13].mxu1 }
 0x53e   :  { %v614_v20 = vadd.f32 %v613_v18, %v545_v13  ;;  %v1145_v21 = vpop.f32.mrb[14].mxu1  ;;  %v1196_v13 = vld [vmem:[%s1600_s16 + $0x18] sm:$0xff]   ;;  %s1274_s16 = smov [#allocation2]  }
 0x53f   :  { %1225 = vtanh.f32 %v622_v17  ;;  %v625_v22 = vadd.f32 %v1145_v21, %v560_v19  ;;  %v616_v23 = vpop.f32.mrb[15].mxu1  ;;  %s1025_s9 = sshll.u32 %s1274_s16, 4  ;;  %s1026_s9 = int_to_ptr.vmem [resolvable:$true] %s1025_s9 }
 0x540   :  { %1227 = vtanh.f32 %v614_v20  ;;  %v617_v24 = vadd.f32 %v616_v23, %v550_v14  ;;  %v851_v14 = vpop.permute.xlu0 %850  ;;  %s1249_s24 = scalar_lea.vmem %s1026_s9, 64  ;;  %p1254_p1 = scmp.lt.s32.totalorder %s1026_s9, %s1026_s9 }
 0x541   :  { %1229 = vtanh.f32 %v625_v22  ;;  %p1250_p0 = scmp.ne.s32.totalorder %s1026_s9, %s1249_s24  ;;  %p1255_p2 = scmp.lt.s32.totalorder %s1249_s24, %s1249_s24 }
 0x542   :  { %1231 = vtanh.f32 %v617_v24 }
 0x543   :  { %p1256_p3 = por %p1255_p2, %p1254_p1 }
 0x544   :  { %v856_v15 = vpop.permute.xlu0 %855 }
 0x545   :  { %p1257_p4 = pnand %p1256_p3, %p1250_p0 }
 0x548   :  { %v861_v21 = vpop.permute.xlu0 %860 }
 0x549   :  { %v1226_v25 = vpop.eup %1225 }
 0x54a   :  { %v1228_v26 = vpop.eup %1227 }
 0x54b   :  { %v1230_v27 = vpop.eup %1229 }
 0x54c   :  { %v1232_v28 = vpop.eup %1231  ;;  %v637_v29 = vpack.c.bf16 %v1230_v27, %v1226_v25  ;;  %v866_v27 = vpop.permute.xlu0 %865 }
 0x54d   :  { %v636_v30 = vpack.c.bf16 %v1232_v28, %v1228_v26 }
 0x54f   :  { %1146 = vmatprep.subr.bf16.mxu0 %v636_v30 }
 0x550   :  { %1147 = vmatpush3.bf16.msra.mxu0 %v636_v30  ;;  %v871_v30 = vpop.permute.xlu0 %870 }
 0x551   :  { %1148 = vmatprep.subr.bf16.mxu0 %v637_v29 }
 0x554   :  { %1149 = vmatpush3.bf16.msra.mxu0 %v637_v29 }
 0x557   :  { %1151 = vmatmul.mubr.msk.bf16.vlgmr.msra.gmra.mrb[4].mxu0 %vm236_vm1, %v1190_v31 }
 0x558   :  { %1166 = vmatprep.mubr.msk.bf16.mxu0 %vm236_vm1, %v1193_v52 }
 0x62a   :  { %v1152_v36 = vpop.f32.mrb[4].mxu0 }
 0x62b   :  { %v721_v37 = vadd.f32 %v1152_v36, %v655_v35  ;;  %v712_v38 = vpop.f32.mrb[5].mxu0  ;;  %v886_v36 = vpop.permute.xlu1 %885 }
 0x62c   :  { %v713_v40 = vadd.f32 %v712_v38, %v645_v33  ;;  %v1153_v41 = vpop.f32.mrb[6].mxu0 }
 0x62d   :  { %1233 = vtanh.f32 %v721_v37  ;;  %v724_v42 = vadd.f32 %v1153_v41, %v660_v39  ;;  %v715_v43 = vpop.f32.mrb[7].mxu0 }
 0x62e   :  { %1235 = vtanh.f32 %v713_v40  ;;  %v716_v44 = vadd.f32 %v715_v43, %v650_v34  ;;  %v881_v34 = vpop.permute.xlu0 %880 }
 0x62f   :  { %1237 = vtanh.f32 %v724_v42 }
 0x630   :  { %1239 = vtanh.f32 %v716_v44 }
 0x637   :  { %v1234_v45 = vpop.eup %1233 }
 0x638   :  { %v1236_v46 = vpop.eup %1235 }
 0x639   :  { %v1238_v47 = vpop.eup %1237 }
 0x63a   :  { %v1240_v48 = vpop.eup %1239  ;;  %v736_v49 = vpack.c.bf16 %v1238_v47, %v1234_v45 }
 0x63b   :  { %v735_v50 = vpack.c.bf16 %v1240_v48, %v1236_v46 }
 0x63d   :  { %1154 = vmatprep.subr.bf16.mxu1 %v735_v50 }
 0x63e   :  { %1155 = vmatpush3.bf16.msra.mxu1 %v735_v50 }
 0x63f   :  { %1156 = vmatprep.subr.bf16.mxu1 %v736_v49 }
 0x642   :  { %1157 = vmatpush3.bf16.msra.mxu1 %v736_v49 }
 0x645   :  { %1159 = vmatmul.mubr.msk.bf16.vlgmr.msra.gmra.mrb[16].mxu1 %vm236_vm1, %v1192_v51 }
 0x718   :  { %v1160_v56 = vpop.f32.mrb[16].mxu1 }
 0x719   :  { %v820_v59 = vadd.f32 %v1160_v56, %v754_v55  ;;  %v811_v60 = vpop.f32.mrb[17].mxu1 }
 0x71a   :  { %v812_v62 = vadd.f32 %v811_v60, %v744_v57  ;;  %v1161_v63 = vpop.f32.mrb[18].mxu1 }
 0x71b   :  { %1241 = vtanh.f32 %v820_v59  ;;  %v823_v0 = vadd.f32 %v1161_v63, %v759_v61  ;;  %v814_v1 = vpop.f32.mrb[19].mxu1 }
 0x71c   :  { %1243 = vtanh.f32 %v812_v62  ;;  %v815_v2 = vadd.f32 %v814_v1, %v749_v53 }
 0x71d   :  { %1245 = vtanh.f32 %v823_v0 }
 0x71e   :  { %1247 = vtanh.f32 %v815_v2 }
 0x725   :  { %v1242_v3 = vpop.eup %1241 }
 0x726   :  { %v1244_v4 = vpop.eup %1243 }
 0x727   :  { %v1246_v7 = vpop.eup %1245 }
 0x728   :  { %v1248_v8 = vpop.eup %1247  ;;  %v839_v9 = vpack.c.bf16 %v1246_v7, %v1242_v3 }
 0x729   :  { %v838_v10 = vpack.c.bf16 %v1248_v8, %v1244_v4 }
 0x72b   :  { %1162 = vmatprep.subr.bf16.mxu0 %v838_v10 }
 0x72c   :  { %1163 = vmatpush3.bf16.msra.mxu0 %v838_v10 }
 0x72d   :  { %1164 = vmatprep.subr.bf16.mxu0 %v839_v9 }
 0x730   :  { %1165 = vmatpush3.bf16.msra.mxu0 %v839_v9 }
 0x733   :  { %1167 = vmatmul.mubr.msk.bf16.vlgmr.msra.gmra.mrb[8].mxu0 %vm236_vm1, %v1194_v11 }
 0x734   :  { %1170 = vmatprep.mubr.msk.bf16.mxu0 %vm236_vm1, %v1195_v12 }
 0x73b   :  { %1171 = vmatmul.mubr.msk.bf16.gmra.mrb[12].mxu0 %vm236_vm1, %v1196_v13 }
 0x806   :  { %v1168_v16 = vpop.f32.mrb[8].mxu0 }
 0x807   :  { %v954_v17 = vpop.f32.mrb[9].mxu0  ;;  %v963_v25 = vadd.f32 %v1168_v16, %v861_v21 }
 0x808   :  { %v955_v18 = vadd.f32 %v954_v17, %v851_v14  ;;  %v1169_v19 = vpop.f32.mrb[10].mxu0 }
 0x809   :  { %v957_v20 = vpop.f32.mrb[11].mxu0  ;;  %v966_v29 = vadd.f32 %v1169_v19, %v866_v27 }
 0x80a   :  { %985 = vxpose.xlu0.b32.start [1/12] (short) (narrow) %v955_v18, 8  ;;  %v958_v22 = vadd.f32 %v957_v20, %v856_v15 }
 0x80e   :  { %v1172_v23 = vpop.f32.mrb[12].mxu0  ;;  %986 = vxpose.xlu0.b32.cont [2/12] (short) (narrow) %v958_v22, 8 }
 0x80f   :  { %v970_v24 = vpop.f32.mrb[13].mxu0  ;;  %v979_v35 = vadd.f32 %v1172_v23, %v881_v34 }
 0x810   :  { %v1173_v26 = vpop.f32.mrb[14].mxu0  ;;  %v971_v31 = vadd.f32 %v970_v24, %v871_v30 }
 0x811   :  { %v973_v28 = vpop.f32.mrb[15].mxu0  ;;  %v982_v37 = vadd.f32 %v1173_v26, %v886_v36 }
 0x812   :  { %987 = vxpose.xlu0.b32.cont [3/12] (short) (narrow) %v963_v25, 8  ;;  %v974_v33 = vadd.f32 %v973_v28, %v876_v32 }
 0x816   :  { %988 = vxpose.xlu0.b32.cont [4/12] (short) (narrow) %v966_v29, 8 }
 0x81a   :  { %989 = vxpose.xlu0.b32.cont [5/12] (short) (narrow) %v971_v31, 8 }
 0x81e   :  { %990 = vxpose.xlu0.b32.cont [6/12] (short) (narrow) %v974_v33, 8 }
 0x822   :  { %991 = vxpose.xlu0.b32.cont [7/12] (short) (narrow) %v979_v35, 8 }
 0x826   :  { %992 = vxpose.xlu0.b32.cont [8/12] (short) (narrow) %v982_v37, 8 }
 0x82a   :  { %993 = vxpose.xlu0.b32.cont [9/12] (short) (narrow) %v1526_v5, 8 }
 0x82e   :  { %994 = vxpose.xlu0.b32.cont [10/12] (short) (narrow) %v1528_v6, 8 }
 0x832   :  { %995 = vxpose.xlu0.b32.cont [11/12] (short) (narrow) %v1520_v54, 8 }
 0x836   :  { %996 = vxpose.xlu0.b32.end [12/12] (short) (narrow) %v1523_v58, 8 }
 0x88a   :  { %v1001_v38 = vpop.trf.xlu0 }
 0x88b   :  { %v1017_v39 = vpack.c.bf16 %v1001_v38, %v1001_v38 }
 0x88d   :  { %1018 = vst [vmem:[#allocation2] sm:$0xf] %v1017_v39 }
 0x88e   :  { %1260 = shalt.err (!%p1257_p4)
}
 0x88f   :  { %s1261_s3 = scalar_lea.hbm %s1602_s18, 64 }
 0x890   :  { %p1262_p5 = scmp.ne.s32.totalorder %s1602_s18, %s1261_s3  ;;  %p1265_p6 = scmp.lt.u32.totalorder %s1261_s3, %s1602_s18 }
 0x892   :  { %p1267_p7 = pnand %p1265_p6, %p1262_p5 }
 0x894   :  { %1270 = shalt.err (!%p1267_p7)
}
 0x895   :  { %1028 = dma.vmem_to_hbm [thread:$0]  %s1026_s9, 64, %s1602_s18, [#allocation3]  }
 0x896   :  { %1271 = dma.done.wait [#allocation3], 64  }
 0x897   :  { %1272 = vsyncadd [#allocation3], 4294967232 }
 0x898   :  { %1032 = vsyncpa [#allocation3], 1 }

</bundles_post_ra>
